<compile_context>
chip_gen: v5e
topology: v5e:2x2
jax: 0.10.0
libtpu: 0.0.40
codegen_flags: <defaults>
</compile_context>

<pallas_src>
import functools

import jax
import jax.numpy as jnp
from jax.experimental import pallas as pl
from jax.experimental.pallas import tpu as pltpu


def _evp_kernel(x_ref, prompt_ref, o_ref, *, l_pad, in_size):
    # x_ref:      (TB, 3, in, in)
    # prompt_ref: (3, S, S)   -- precomputed sigmoid(program) * mask (grid-invariant)
    # o_ref:      (TB, 3, S, S)
    tb = o_ref.shape[0]
    prompt = prompt_ref[...].astype(o_ref.dtype)            # (3, S, S)

    # Full-canvas store of the batch-invariant prompt, one image at a time
    # (avoids materializing a (TB, 3, S, S) temporary in vregs).
    for b in range(tb):                                     # tb is small & static
        o_ref[b] = prompt

    # Interior read-modify-write: add the (implicitly zero-padded) input.
    # l_pad / in_size are static Python ints, so these are static windows.
    hw = pl.ds(l_pad, in_size)
    o_ref[:, :, hw, hw] = o_ref[:, :, hw, hw] + x_ref[...].astype(o_ref.dtype)


def expansive_visual_prompt(x, program, mask_padded, *, l_pad,
                            batch_tile=8, out_dtype=None):
    """x: (B, 3, in, in); program / mask_padded: (3, S, S) f32."""
    B, C, in_size, _ = x.shape
    assert C == 3
    S = program.shape[-1]
    out_dtype = out_dtype if out_dtype is not None else x.dtype

    # Grid-invariant prompt computed once here (tiny XLA op) instead of redoing
    # the EUP sigmoid + VPU multiply on every grid step inside the kernel.
    prompt = jax.nn.sigmoid(program) * mask_padded          # (3, S, S)

    # Pick the batch tile: largest value <= batch_tile that divides B, and keep
    # at least 2 grid steps when possible so both v7x TensorCores get work.
    tb = max(1, min(batch_tile, B))
    if B >= 2:
        tb = max(1, min(tb, B // 2))
    while B % tb:
        tb -= 1

    kernel = functools.partial(_evp_kernel, l_pad=l_pad, in_size=in_size)

    # VMEM budget: double-buffered x/out blocks + the single resident prompt.
    itemsize = jnp.dtype(jnp.float32).itemsize
    block_bytes = (2 * tb * 3 * (S * S + in_size * in_size) + 3 * S * S) * itemsize
    vmem_limit = int(min(max(2 * block_bytes, 32 * 1024 * 1024), 48 * 1024 * 1024))

    return pl.pallas_call(
        kernel,
        out_shape=jax.ShapeDtypeStruct((B, 3, S, S), out_dtype),
        grid=(B // tb,),
        in_specs=[
            pl.BlockSpec((tb, 3, in_size, in_size), lambda i: (i, 0, 0, 0)),
            pl.BlockSpec((3, S, S), lambda i: (0, 0, 0)),
        ],
        out_specs=pl.BlockSpec((tb, 3, S, S), lambda i: (i, 0, 0, 0)),
        compiler_params=pltpu.CompilerParams(
            dimension_semantics=("parallel",),
            vmem_limit_bytes=vmem_limit,
        ),
    )(x, prompt)


def build_params(mask_2d, out_size, *, init="randn", key=None):
    """Mirror ExpansiveVisualPrompt.__init__ (deterministic, no checkpoint)."""
    in_size = mask_2d.shape[0]
    assert mask_2d.shape[0] == mask_2d.shape[1]
    l_pad = int((out_size - in_size + 1) / 2)
    r_pad = int((out_size - in_size) / 2)
    if init == "zero":
        program = jnp.zeros((3, out_size, out_size), jnp.float32)
    elif init == "randn":
        program = jax.random.normal(key, (3, out_size, out_size), jnp.float32)
    else:
        raise ValueError("init method not supported")
    mask3 = jnp.repeat(mask_2d[None, :, :], repeats=3, axis=0)       # (3, in, in)
    mask_padded = jnp.pad(mask3,
                          ((0, 0), (l_pad, r_pad), (l_pad, r_pad)),
                          constant_values=1.0)                       # (3, S, S)
    return program, mask_padded, l_pad, r_pad


if __name__ == "__main__":
    B, C, in_size, out_size = 4, 3, 16, 32

    key = jax.random.PRNGKey(0)
    k_x, k_m, k_p = jax.random.split(key, 3)

    x = jax.random.normal(k_x, (B, C, in_size, in_size), jnp.float32)
    # deterministic binary mask, like a typical visual-prompt mask
    mask_2d = (jax.random.uniform(k_m, (in_size, in_size)) > 0.5).astype(jnp.float32)

    program, mask_padded, l_pad, r_pad = build_params(
        mask_2d, out_size, init="randn", key=k_p)

    out = expansive_visual_prompt(x, program, mask_padded,
                                  l_pad=l_pad, batch_tile=2)
    out = jax.block_until_ready(out)

    # pure-JAX reference (same math as the PyTorch forward)
    x_pad = jnp.pad(x, ((0, 0), (0, 0), (l_pad, r_pad), (l_pad, r_pad)))
    ref = x_pad + jax.nn.sigmoid(program)[None] * mask_padded[None]
    assert out.shape == (B, 3, out_size, out_size)
    assert jnp.allclose(out, ref, atol=1e-6, rtol=1e-6)

    print("KERNEL_OK")
</pallas_src>

<mosaic_0001>
module attributes {stable_mosaic.version = 11 : i64} {
  func.func @_evp_kernel(%arg0: i32, %arg1: memref<2x3x16x16xf32, #tpu.memory_space<vmem>>, %arg2: memref<3x32x32xf32, #tpu.memory_space<vmem>>, %arg3: memref<2x3x32x32xf32, #tpu.memory_space<vmem>>) attributes {dimension_semantics = [#tpu.dimension_semantics<parallel>], iteration_bounds = array<i64: 2>, scalar_prefetch = 0 : i64, scratch_operands = 0 : i64, tpu.core_type = #tpu.core_type<tc>, window_params = [{transform_indices = @transform_0, window_bounds = array<i64: 2, 3, 16, 16>}, {pipeline_mode = #tpu.pipeline_mode<synchronous>, transform_indices = @transform_1, window_bounds = array<i64: 3, 32, 32>}, {transform_indices = @transform_2, window_bounds = array<i64: 2, 3, 32, 32>}]} {
    %c0 = arith.constant 0 : index
    %c0_0 = arith.constant 0 : index
    %c0_1 = arith.constant 0 : index
    %0 = vector.load %arg2[%c0, %c0_0, %c0_1] : memref<3x32x32xf32, #tpu.memory_space<vmem>>, vector<3x32x32xf32>
    %c0_2 = arith.constant 0 : index
    %c0_3 = arith.constant 0 : index
    %c0_4 = arith.constant 0 : index
    %c0_5 = arith.constant 0 : index
    %1 = vector.load %arg3[%c0_2, %c0_3, %c0_4, %c0_5] : memref<2x3x32x32xf32, #tpu.memory_space<vmem>>, vector<1x3x32x32xf32>
    %2 = vector.shape_cast %1 : vector<1x3x32x32xf32> to vector<3x32x32xf32>
    %3 = vector.shape_cast %0 : vector<3x32x32xf32> to vector<1x3x32x32xf32>
    tpu.vector_store %arg3[%c0_2, %c0_3, %c0_4, %c0_5], %3 {strides = array<i32>} : memref<2x3x32x32xf32, #tpu.memory_space<vmem>>, vector<1x3x32x32xf32>,
    %c1 = arith.constant 1 : index
    %c0_6 = arith.constant 0 : index
    %c0_7 = arith.constant 0 : index
    %c0_8 = arith.constant 0 : index
    %4 = vector.load %arg3[%c1, %c0_6, %c0_7, %c0_8] : memref<2x3x32x32xf32, #tpu.memory_space<vmem>>, vector<1x3x32x32xf32>
    %5 = vector.shape_cast %4 : vector<1x3x32x32xf32> to vector<3x32x32xf32>
    %6 = vector.shape_cast %0 : vector<3x32x32xf32> to vector<1x3x32x32xf32>
    tpu.vector_store %arg3[%c1, %c0_6, %c0_7, %c0_8], %6 {strides = array<i32>} : memref<2x3x32x32xf32, #tpu.memory_space<vmem>>, vector<1x3x32x32xf32>,
    %c0_9 = arith.constant 0 : index
    %c0_10 = arith.constant 0 : index
    %c8 = arith.constant 8 : index
    %c8_11 = arith.constant 8 : index
    %7 = vector.load %arg3[%c0_9, %c0_10, %c8, %c8_11] : memref<2x3x32x32xf32, #tpu.memory_space<vmem>>, vector<2x3x16x16xf32>
    %c0_12 = arith.constant 0 : index
    %c0_13 = arith.constant 0 : index
    %c0_14 = arith.constant 0 : index
    %c0_15 = arith.constant 0 : index
    %8 = vector.load %arg1[%c0_12, %c0_13, %c0_14, %c0_15] : memref<2x3x16x16xf32, #tpu.memory_space<vmem>>, vector<2x3x16x16xf32>
    %9 = arith.addf %7, %8 : vector<2x3x16x16xf32>
    %c0_16 = arith.constant 0 : index
    %c0_17 = arith.constant 0 : index
    %c8_18 = arith.constant 8 : index
    %c8_19 = arith.constant 8 : index
    %10 = vector.load %arg3[%c0_16, %c0_17, %c8_18, %c8_19] : memref<2x3x32x32xf32, #tpu.memory_space<vmem>>, vector<2x3x16x16xf32>
    tpu.vector_store %arg3[%c0_16, %c0_17, %c8_18, %c8_19], %9 {strides = array<i32>} : memref<2x3x32x32xf32, #tpu.memory_space<vmem>>, vector<2x3x16x16xf32>,
    return
  }
  func.func @transform_0(%arg0: i32) -> (i32, i32, i32, i32) {
    %c0_i32 = arith.constant 0 : i32
    %c0_i32_0 = arith.constant 0 : i32
    %c0_i32_1 = arith.constant 0 : i32
    %c0_i32_2 = arith.constant 0 : i32
    return %arg0, %c0_i32, %c0_i32_0, %c0_i32_1 : i32, i32, i32, i32
  }
  func.func @transform_1(%arg0: i32) -> (i32, i32, i32) {
    %c0_i32 = arith.constant 0 : i32
    %c0_i32_0 = arith.constant 0 : i32
    %c0_i32_1 = arith.constant 0 : i32
    %c0_i32_2 = arith.constant 0 : i32
    return %c0_i32, %c0_i32_0, %c0_i32_1 : i32, i32, i32
  }
  func.func @transform_2(%arg0: i32) -> (i32, i32, i32, i32) {
    %c0_i32 = arith.constant 0 : i32
    %c0_i32_0 = arith.constant 0 : i32
    %c0_i32_1 = arith.constant 0 : i32
    %c0_i32_2 = arith.constant 0 : i32
    return %arg0, %c0_i32, %c0_i32_0, %c0_i32_1 : i32, i32, i32, i32
  }
}

</mosaic_0001>

<bundles_post_ra>
// kernel: tpu_custom_call.1
= control target key start
LH: loop header
LB: loop body
LE: loop exit
PB: predicated region body
PF: predicated region fallthrough
CT: control target
= control target key end

     0   :  { %7 = vsyncpa [#allocation3], 0  ;;  %s908_s0 = inlined_call_operand.hbm [shape: f32[4,3,16,16], index: 0, kind: input, shape index: {}]   ;;  %s909_s1 = inlined_call_operand.hbm [shape: f32[3,32,32], index: 1, kind: input, shape index: {}]   ;;  %s910_s2 = inlined_call_operand.hbm [shape: f32[4,3,32,32], index: 2, kind: output, shape index: {}]  }
   0x1   :  { %9 = vsyncpa [#allocation3 + $0x1], 0 }
   0x2   :  { %10 = vsyncpa [#allocation6], 0 }
   0x3   :  { %11 = vsyncpa [#allocation4], 0 }
   0x4   :  { %13 = vsyncpa [#allocation4 + $0x1], 0  ;;  %s663_s9 = smov 0   ;;  %s665_s10 = smov 0  }
   0x5   :  { %s667_s11 = smov 0   ;;  %s669_s12 = smov 0  }
   0x6 LB: > { %s684_s13 = sadd.s32 4294967295, %s641_s12   ;;  %s419_s14 = sadd.s32 4294967294, %s641_s12   ;;  %s641_s12 = sphi %s669_s12, %s920_s12   ;;  %s637_s11 = sphi %s667_s11, %s919_s11   ;;  %s633_s10 = sphi %s665_s10, %s918_s10   ;;  %s629_s9 = sphi %s663_s9, %s917_s9  }
   0x7   : > { %p39_p0 = scmp.ne.s32.totalorder %s633_s10, %s629_s9  ;;  %p40_p1 = scmp.eq.s32.totalorder %s684_s13, 0 }
   0x8   : > { %p84_p2 = scmp.eq.s32.totalorder %s684_s13, 1  ;;  %p90_p3 = scmp.eq.s32.totalorder %s419_s14, 1 }
   0x9   : > { %p693_p4 = por %p40_p1, %p39_p0  ;;  %p420_p5 = scmp.ge.s32.totalorder %s641_s12, 1 }
   0xa   : > { %p698_p6 = por %p90_p3, %p39_p0  ;;  %p97_p7 = scmp.lt.s32.totalorder %s641_s12, 3 }
   0xb   : > { %s108_s19 = sshll.u32 %s909_s1, 4  ;;  %s643_s21 = smov [#allocation5]   ;;  %s109_s19 = int_to_ptr.hbm [resolvable:$true] %s108_s19 }
   0xc   : > { %p706_p8 = pnand %p420_p5, %p97_p7  ;;  %s110_s22 = sshll.u32 %s643_s21, 4  ;;  %s111_s22 = int_to_ptr.vmem [resolvable:$true] %s110_s22 }
   0xd   : > { %s716_s23 = sadd.s32 1, %s641_s12   ;;  %s644_s24 = smov 128  }
   0xe   : > { %p458_p9 = pneg %p706_p8  ;;  %s645_s25 = smov 8  }
   0xf   : > { %s23_s26 = ssub.s32 %s641_s12, %s716_s23  ;;  %s26_s27 = sadd.s32 1, %s637_s11 }
  0x10   : > { %p459_p10 = pnand %p458_p9, %p40_p1  ;;  %p24_p12 = scmp.eq.s32.totalorder %s23_s26, 0 }
  0x11   : > { %p33_p13 = scmp.ne.s32.totalorder %s637_s11, %s633_s10  ;;  %p34_p0 = scmp.eq.s32.totalorder %s641_s12, 0 }
  0x12   : > { %461 = dma.hbm_to_vmem [thread:$0]  (!%p459_p10), %s109_s19, 1536, %s111_s22, [#allocation6], %s644_s24, %s644_s24, %s645_s25  }
  0x13   : > { %p471_p3 = scmp.lt.s32.totalorder %s641_s12, 2  ;;  %p35_p5 = por %p34_p0, %p33_p13 }
  0x14   : > { %s729_s28 = scalar_select %p24_p12, %s637_s11, %s26_s27  }
  0x15   : > { %p733_p7 = por %p84_p2, %p33_p13  ;;  %s124_s30 = sand.u32 1, %s637_s11  }
  0x16   : > { %s446_s3 = smul.u32 96, %s641_s12  ;;  %p742_p9 = pnand %p471_p3, %p35_p5 }
  0x17   : > { %s445_s4 = smul.u32 96, %s124_s30  ;;  %s125_s19 = scalar_lea.sflag [#allocation3], %s124_s30 }
  0x18   : > { %s134_s7 = scalar_lea.hbm %s908_s0, %s446_s3  ;;  %p545_p10 = pneg %p742_p9 }
  0x19   : > { %s135_s14 = sshll.u32 %s134_s7, 4  ;;  %s128_s17 = scalar_lea.vmem [#allocation2], %s445_s4  ;;  %s136_s14 = int_to_ptr.hbm [resolvable:$true] %s135_s14 }
  0x1a   : > { %s137_s18 = sshll.u32 %s128_s17, 4  ;;  %s541_s21 = sshra.s32 %s136_s14, 4  ;;  %s138_s18 = int_to_ptr.vmem [resolvable:$true] %s137_s18  ;;  %s542_s21 = int_to_ptr.hbm [resolvable:$true] %s541_s21 }
  0x1b   : > { %s543_s22 = scalar_lea.hbm %s542_s21, 96  ;;  %s548_s3 = scalar_lea.hbm %s908_s0, 192 }
  0x1c   : > { %p544_p2 = scmp.ne.s32.totalorder %s542_s21, %s543_s22  ;;  %p549_p0 = scmp.lt.s32.totalorder %s542_s21, %s908_s0 }
  0x1d   : > { %p550_p3 = scmp.lt.s32.totalorder %s548_s3, %s543_s22 }
  0x1e   : > { %p546_p12 = pnand %p545_p10, %p544_p2 }
  0x1f   : > { %p551_p5 = por %p550_p3, %p549_p0 }
  0x20   : > { %p547_p13 = pneg %p546_p12 }
  0x22   : > { %p552_p11 = pnand %p551_p5, %p547_p13 }
  0x24   : > { %555 = shalt.err (!%p552_p11)
}
  0x25   : > { %465 = dma.hbm_to_vmem [thread:$0]  (!%p742_p9), %s136_s14, 1536, %s138_s18, %s125_s19, %s644_s24, %s644_s24, %s645_s25  }
  0x26   : > { %149 = sbr.rel (%p706_p8) target bundleno = 193 (0xc1), region = 28  ;;  %s762_s30 = sand.u32 (!%p706_p8), 1, %s633_s10  }
  0x27   : > { %s447_s4 = smul.u32 (!%p706_p8), 96, %s762_s30  ;;  %s152_s7 = scalar_lea.sflag (!%p706_p8), [#allocation3], %s762_s30 }
  0x29   : > { %s155_s17 = scalar_lea.vmem (!%p706_p8), [#allocation2], %s447_s4 }
  0x2b   : > { %616 = dma.done.wait (%p693_p4), %s152_s7, 1536  }
  0x2c   : > { %618 = vsyncadd (%p693_p4), %s152_s7, 4294965760 }
  0x2d   : > { %620 = dma.done.wait (%p40_p1), [#allocation6], 1536  }
  0x2e   : > { %622 = vsyncadd (%p40_p1), [#allocation6], 4294965760  ;;  %v236_v0 = vld [vmem:[%s155_s17 + $0x10] sm:$0xff]  ;;  %v234_v1 = vld [vmem:[%s155_s17] sm:$0xff]  ;;  %s646_s20 = smov 8   ;;  %s448_s15 = smul.u32 192, %s762_s30 }
  0x2f   : > { %262 = vrot.lane.b32.xlu1 %v236_v0, %s646_s20  ;;  %258 = vrot.lane.b32.xlu0 %v234_v1, %s646_s20  ;;  %v238_v2 = vld [vmem:[%s155_s17 + $0x20] sm:$0xff]  ;;  %v237_v3 = vld [vmem:[%s155_s17 + $0x18] sm:$0xff]  ;;  %vm196_vm0 = vcmask 261120   ;;  %v193_v12 = vld [vmem:[#allocation5 + $0x48] sm:$0xff]  ;;  %vm306_vm1 = vcmask 195648   ;;  %s449_s25 = smul.u32 192, %s684_s13 }
  0x30   : > { %266 = vrot.lane.b32.xlu2 %v238_v2, %s646_s20  ;;  %v235_v4 = vld [vmem:[%s155_s17 + $0x8] sm:$0xff]  ;;  %v241_v6 = vld [vmem:[%s155_s17 + $0x38] sm:$0xff]  ;;  %v240_v7 = vld [vmem:[%s155_s17 + $0x30] sm:$0xff]  ;;  %s787_s24 = scalar_lea.vmem [#allocation7], %s448_s15  ;;  %s320_s13 = scalar_lea.sflag [#allocation4], %s762_s30 }
  0x31   : > { %v239_v5 = vld [vmem:[%s155_s17 + $0x28] sm:$0xff]  ;;  %v242_v8 = vld [vmem:[%s155_s17 + $0x40] sm:$0xff]  ;;  %v244_v9 = vld [vmem:[%s155_s17 + $0x50] sm:$0xff]  ;;  %206 = vst.msk [vmem:[%s787_s24 + $0x48] sm:$0xff] %vm196_vm0, %v193_v12  ;;  %s332_s18 = scalar_lea.hbm %s910_s2, %s449_s25  ;;  %s333_s19 = sshll.u32 %s787_s24, 4  ;;  %s334_s19 = int_to_ptr.vmem [resolvable:$true] %s333_s19 }
  0x32   : > { %v243_v10 = vld [vmem:[%s155_s17 + $0x48] sm:$0xff]  ;;  %v245_v11 = vld [vmem:[%s155_s17 + $0x58] sm:$0xff]  ;;  %437 = vst.msk [vmem:[%s787_s24 + $0xa8] sm:$0xff] %vm196_vm0, %v193_v12  ;;  %v194_v15 = vld [vmem:[#allocation5 + $0x50] sm:$0xff]  ;;  %s335_s21 = sshll.u32 %s332_s18, 4  ;;  %s591_s5 = scalar_lea.hbm %s910_s2, 384  ;;  %s336_s21 = int_to_ptr.hbm [resolvable:$true] %s335_s21 }
  0x33   : > { %v189_v13 = vld [vmem:[#allocation5 + $0x28] sm:$0xff]  ;;  %v190_v16 = vld [vmem:[#allocation5 + $0x30] sm:$0xff]  ;;  %207 = vst.msk [vmem:[%s787_s24 + $0x50] sm:$0xff] %vm196_vm0, %v194_v15  ;;  %v184_v27 = vld [vmem:[#allocation5] sm:$0xff]  ;;  %s585_s22 = sshra.s32 %s336_s21, 4  ;;  %s586_s22 = int_to_ptr.hbm [resolvable:$true] %s585_s22 }
  0x34   : > { %v185_v14 = vld [vmem:[#allocation5 + $0x8] sm:$0xff]  ;;  %202 = vst.msk [vmem:[%s787_s24 + $0x28] sm:$0xff] %vm196_vm0, %v189_v13  ;;  %v186_v17 = vld [vmem:[#allocation5 + $0x10] sm:$0xff]  ;;  %v187_v28 = vld [vmem:[#allocation5 + $0x18] sm:$0xff]  ;;  %s587_s26 = scalar_lea.hbm %s586_s22, 192  ;;  %p592_p11 = scmp.lt.s32.totalorder %s586_s22, %s910_s2 }
  0x35   : > { %433 = vst.msk [vmem:[%s787_s24 + $0x88] sm:$0xff] %vm196_vm0, %v189_v13  ;;  %v188_v29 = vld [vmem:[#allocation5 + $0x20] sm:$0xff]  ;;  %v191_v30 = vld [vmem:[#allocation5 + $0x38] sm:$0xff]  ;;  %p588_p1 = scmp.ne.s32.totalorder %s586_s22, %s587_s26  ;;  %p593_p9 = scmp.lt.s32.totalorder %s591_s5, %s587_s26 }
  0x36   : > { %198 = vst.msk [vmem:[%s787_s24 + $0x8] sm:$0xff] %vm196_vm0, %v185_v14  ;;  %v192_v33 = vld [vmem:[#allocation5 + $0x40] sm:$0xff]  ;;  %v195_v34 = vld [vmem:[#allocation5 + $0x58] sm:$0xff] }
  0x37   : > { %264 = vrot.lane.b32.xlu1 %v237_v3, %s646_s20  ;;  %260 = vrot.lane.b32.xlu0 %v235_v4, %s646_s20  ;;  %429 = vst.msk [vmem:[%s787_s24 + $0x68] sm:$0xff] %vm196_vm0, %v185_v14  ;;  %p589_p4 = pnand %p588_p1, %p733_p7  ;;  %p594_p2 = por %p593_p9, %p592_p11 }
  0x38   : > { %268 = vrot.lane.b32.xlu2 %v239_v5, %s646_s20  ;;  %438 = vst.msk [vmem:[%s787_s24 + $0xb0] sm:$0xff] %vm196_vm0, %v194_v15  ;;  %v226_v18 = vld [vmem:[%s787_s24 + $0x48] sm:$0xff] }
  0x39   : > { %203 = vst.msk [vmem:[%s787_s24 + $0x30] sm:$0xff] %vm196_vm0, %v190_v16  ;;  %v232_v54 = vld [vmem:[%s787_s24 + $0xa8] sm:$0xff]  ;;  %p590_p8 = pneg %p589_p4 }
  0x3a   : > { %434 = vst.msk [vmem:[%s787_s24 + $0x90] sm:$0xff] %vm196_vm0, %v190_v16  ;;  %v227_v21 = vld [vmem:[%s787_s24 + $0x50] sm:$0xff] }
  0x3b   : > { %199 = vst.msk [vmem:[%s787_s24 + $0x10] sm:$0xff] %vm196_vm0, %v186_v17  ;;  %v224_v31 = vld [vmem:[%s787_s24 + $0x28] sm:$0xff]  ;;  %p595_p10 = pnand %p594_p2, %p590_p8 }
  0x3c   : > { %430 = vst.msk [vmem:[%s787_s24 + $0x70] sm:$0xff] %vm196_vm0, %v186_v17  ;;  %v230_v24 = vld [vmem:[%s787_s24 + $0x88] sm:$0xff] }
  0x3d   : > { %197 = vst.msk [vmem:[%s787_s24] sm:$0xff] %vm196_vm0, %v184_v27  ;;  %v222_v32 = vld [vmem:[%s787_s24 + $0x8] sm:$0xff] }
  0x3e   : > { %200 = vst.msk [vmem:[%s787_s24 + $0x18] sm:$0xff] %vm196_vm0, %v187_v28  ;;  %v228_v49 = vld [vmem:[%s787_s24 + $0x68] sm:$0xff] }
  0x3f   : > { %272 = vrot.lane.b32.xlu1 %v241_v6, %s646_s20  ;;  %270 = vrot.lane.b32.xlu0 %v240_v7, %s646_s20  ;;  %201 = vst.msk [vmem:[%s787_s24 + $0x20] sm:$0xff] %vm196_vm0, %v188_v29  ;;  %v233_v37 = vld [vmem:[%s787_s24 + $0xb0] sm:$0xff] }
  0x40   : > { %274 = vrot.lane.b32.xlu2 %v242_v8, %s646_s20  ;;  %204 = vst.msk [vmem:[%s787_s24 + $0x38] sm:$0xff] %vm196_vm0, %v191_v30  ;;  %v225_v42 = vld [vmem:[%s787_s24 + $0x30] sm:$0xff] }
  0x41   : > { %205 = vst.msk [vmem:[%s787_s24 + $0x40] sm:$0xff] %vm196_vm0, %v192_v33  ;;  %v231_v55 = vld [vmem:[%s787_s24 + $0x90] sm:$0xff] }
  0x42   : > { %208 = vst.msk [vmem:[%s787_s24 + $0x58] sm:$0xff] %vm196_vm0, %v195_v34  ;;  %v223_v43 = vld [vmem:[%s787_s24 + $0x10] sm:$0xff] }
  0x43   : > { %428 = vst.msk [vmem:[%s787_s24 + $0x60] sm:$0xff] %vm196_vm0, %v184_v27  ;;  %v229_v48 = vld [vmem:[%s787_s24 + $0x70] sm:$0xff] }
  0x44   : > { %431 = vst.msk [vmem:[%s787_s24 + $0x78] sm:$0xff] %vm196_vm0, %v187_v28 }
  0x45   : > { %432 = vst.msk [vmem:[%s787_s24 + $0x80] sm:$0xff] %vm196_vm0, %v188_v29 }
  0x46   : > { %435 = vst.msk [vmem:[%s787_s24 + $0x98] sm:$0xff] %vm196_vm0, %v191_v30 }
  0x47   : > { %278 = vrot.lane.b32.xlu1 %v244_v9, %s646_s20  ;;  %276 = vrot.lane.b32.xlu0 %v243_v10, %s646_s20  ;;  %436 = vst.msk [vmem:[%s787_s24 + $0xa0] sm:$0xff] %vm196_vm0, %v192_v33 }
  0x48   : > { %280 = vrot.lane.b32.xlu2 %v245_v11, %s646_s20  ;;  %439 = vst.msk [vmem:[%s787_s24 + $0xb8] sm:$0xff] %vm196_vm0, %v195_v34 }
  0x8a   : > { %v267_v19 = vpop.permute.xlu2 %266 }
  0x8b   : > { %v298_v20 = vadd.f32 %v267_v19, %v226_v18 }
  0x8d   : > { %311 = vst.msk [vmem:[%s787_s24 + $0x48] sm:$0xff] %vm306_vm1, %v298_v20 }
  0x92   : > { %v269_v22 = vpop.permute.xlu2 %268 }
  0x93   : > { %v299_v23 = vadd.f32 %v269_v22, %v227_v21 }
  0x95   : > { %312 = vst.msk [vmem:[%s787_s24 + $0x50] sm:$0xff] %vm306_vm1, %v299_v23 }
  0x9a   : > { %v275_v25 = vpop.permute.xlu2 %274 }
  0x9b   : > { %v302_v26 = vadd.f32 %v275_v25, %v230_v24 }
  0x9d   : > { %315 = vst.msk [vmem:[%s787_s24 + $0x88] sm:$0xff] %vm306_vm1, %v302_v26 }
  0xa1   : > { %v263_v35 = vpop.permute.xlu1 %262  ;;  %v259_v36 = vpop.permute.xlu0 %258 }
  0xa2   : > { %v296_v38 = vadd.f32 %v263_v35, %v224_v31  ;;  %v294_v39 = vadd.f32 %v259_v36, %v222_v32  ;;  %v281_v40 = vpop.permute.xlu2 %280 }
  0xa3   : > { %v305_v41 = vadd.f32 %v281_v40, %v233_v37 }
  0xa4   : > { %309 = vst.msk [vmem:[%s787_s24 + $0x28] sm:$0xff] %vm306_vm1, %v296_v38 }
  0xa5   : > { %307 = vst.msk [vmem:[%s787_s24 + $0x8] sm:$0xff] %vm306_vm1, %v294_v39 }
  0xa6   : > { %318 = vst.msk [vmem:[%s787_s24 + $0xb0] sm:$0xff] %vm306_vm1, %v305_v41 }
  0xa9   : > { %v265_v44 = vpop.permute.xlu1 %264  ;;  %v261_v45 = vpop.permute.xlu0 %260 }
  0xaa   : > { %v297_v46 = vadd.f32 %v265_v44, %v225_v42  ;;  %v295_v47 = vadd.f32 %v261_v45, %v223_v43 }
  0xac   : > { %310 = vst.msk [vmem:[%s787_s24 + $0x30] sm:$0xff] %vm306_vm1, %v297_v46 }
  0xad   : > { %308 = vst.msk [vmem:[%s787_s24 + $0x10] sm:$0xff] %vm306_vm1, %v295_v47 }
  0xb1   : > { %v273_v50 = vpop.permute.xlu1 %272  ;;  %v271_v51 = vpop.permute.xlu0 %270 }
  0xb2   : > { %v301_v52 = vadd.f32 %v273_v50, %v229_v48  ;;  %v300_v53 = vadd.f32 %v271_v51, %v228_v49 }
  0xb4   : > { %314 = vst.msk [vmem:[%s787_s24 + $0x70] sm:$0xff] %vm306_vm1, %v301_v52 }
  0xb5   : > { %313 = vst.msk [vmem:[%s787_s24 + $0x68] sm:$0xff] %vm306_vm1, %v300_v53 }
  0xb9   : > { %v279_v56 = vpop.permute.xlu1 %278  ;;  %v277_v57 = vpop.permute.xlu0 %276 }
  0xba   : > { %v304_v58 = vadd.f32 %v279_v56, %v232_v54  ;;  %v303_v59 = vadd.f32 %v277_v57, %v231_v55 }
  0xbc   : > { %317 = vst.msk [vmem:[%s787_s24 + $0xa8] sm:$0xff] %vm306_vm1, %v304_v58 }
  0xbd   : > { %316 = vst.msk [vmem:[%s787_s24 + $0x90] sm:$0xff] %vm306_vm1, %v303_v59 }
  0xbe   : > { %598 = shalt.err (!%p595_p10)
}
  0xbf   : > { %s647_s30 = smov 128  }
  0xc0   : > { %456 = dma.vmem_to_hbm [thread:$0]  (%p733_p7), %s334_s19, 3072, %s336_s21, %s320_s13, %s647_s30, %s647_s30, %s646_s20  }
  0xc1 PF: > { %s350_s7 = sand.u32 1, %s629_s9   ;;  %p916_p12 = scmp.ge.s32.totalorder %s641_s12, 2 }
  0xc2   : > { %s351_s17 = scalar_lea.sflag [#allocation4], %s350_s7 }
  0xc3   : > { %p467_p13 = pnand %p916_p12, %p698_p6 }
  0xc5   : > { %p468_p0 = pneg %p467_p13 }
  0xc7   : > { %624 = dma.done.wait (%p468_p0), %s351_s17, 3072  }
  0xc8   : > { %626 = vsyncadd (%p468_p0), %s351_s17, 4294964224  ;;  %p16_p3 = scmp.ge.s32.totalorder %s716_s23, 4   ;;  %s917_s9 = smov %s633_s10 }
  0xc9   : > { %s918_s10 = smov %s637_s11  ;;  %s919_s11 = smov %s729_s28 }
  0xca   : > { %s920_s12 = smov %s716_s23  ;;  %18 = sbr.rel (!%p16_p3) target bundleno = 6 (0x6), region = 78 }
  0xcf   :  { %357 = vsyncpa [#allocation3], 1 }
  0xd0   :  { %359 = vsyncpa [#allocation3 + $0x1], 1 }
  0xd1   :  { %360 = vsyncpa [#allocation6], 1 }
  0xd2   :  { %361 = vsyncpa [#allocation4], 1 }
  0xd3   :  { %363 = vsyncpa [#allocation4 + $0x1], 1 }

</bundles_post_ra>
